<compile_context>
chip_gen: v7x
topology: tpu7x:2x2x1
jax: 0.10.0
libtpu: 0.0.40
codegen_flags: <defaults>
</compile_context>

<pallas_src>
import functools

import jax
import jax.numpy as jnp
from jax.experimental import pallas as pl
from jax.experimental.pallas import tpu as pltpu


def _focal_loss_kernel(preds_ref, tgt_ref, out_ref, acc_ref, *,
                       gamma, hw, tn, n_inner, nj, needs_mask):
    o = pl.program_id(1)   # outer spatial chunk (parallel)
    j = pl.program_id(2)   # inner spatial tile (arbitrary / reduction)

    @pl.when(j == 0)
    def _():
        acc_ref[...] = jnp.zeros_like(acc_ref)

    x = preds_ref[0].astype(jnp.float32)       # (C, tn): classes on sublanes, spatial on lanes
    t = tgt_ref[0].astype(jnp.int32)           # (1, tn): target class per spatial position

    # Numerically-stable log-softmax over the class (sublane) axis.
    m = jnp.max(x, axis=0, keepdims=True)                                # (1, tn)
    lse = m + jnp.log(jnp.sum(jnp.exp(x - m), axis=0, keepdims=True))    # (1, tn)

    # Gather the target-class logit via a sublane one-hot, then logpt = x_t - lse.
    C = x.shape[0]
    cls = jax.lax.broadcasted_iota(jnp.int32, (C, 1), 0)                 # (C, 1) -> broadcast
    x_t = jnp.sum(jnp.where(cls == t, x, 0.0), axis=0, keepdims=True)    # (1, tn)
    logpt = x_t - lse                                                    # (1, tn)

    pt = jnp.exp(logpt)
    om = 1.0 - pt
    # Focal weight (1 - pt) ** gamma; small integer gamma -> cheap VALU multiplies.
    g_int = int(gamma)
    if float(g_int) == float(gamma) and 0 <= g_int <= 8:
        if g_int == 0:
            w = jnp.ones_like(om)
        else:
            w = om
            for _ in range(g_int - 1):
                w = w * om
    else:
        w = om ** jnp.float32(gamma)
    loss = -w * logpt                                                    # (1, tn)

    if needs_mask:
        # Only the globally-last spatial tile can be ragged; gate the mask to it
        # so the common path carries no extra VALU filler.
        tile = o * n_inner + j

        @pl.when(tile == nj - 1)
        def _():
            col = tile * tn + jax.lax.broadcasted_iota(jnp.int32, loss.shape, 1)
            # jnp.where, not multiply: edge-tile padding is undefined (may be NaN/inf).
            acc_ref[...] += jnp.where(col < hw, loss, 0.0)

        @pl.when(tile < nj - 1)
        def _():
            acc_ref[...] += loss
    else:
        acc_ref[...] += loss

    @pl.when(j == n_inner - 1)
    def _():
        out_ref[...] = jnp.sum(acc_ref[...]).reshape(1, 1, 1, 1)


_TARGET_TILE_BYTES = 6 * 1024 * 1024   # ~6 MiB preds per block (double-buffered ~12 MiB)


def _pick_tn(C, HW, itemsize, requested=None):
    """Lane-tile size: multiple of 128, byte-budgeted, or the full HW if smaller."""
    if requested is not None:
        tn = max(128, (int(requested) // 128) * 128)
        return HW if HW <= tn else tn
    tn = _TARGET_TILE_BYTES // max(1, C * itemsize)
    tn = max(128, (tn // 128) * 128)
    if HW <= tn:
        return HW          # full spatial extent in one block (always legal)
    # Prefer a 128-multiple that divides HW (no ragged tile); among those prefer
    # an even tile count so the outer spatial axis can be split across TensorCores.
    lo = max(128, tn // 2)
    fallback = None
    for cand in range(tn, lo - 1, -128):
        if HW % cand == 0:
            if (HW // cand) % 2 == 0:
                return cand
            if fallback is None:
                fallback = cand
    return fallback if fallback is not None else tn


def focal_loss(preds_nchw, target_nhw, *, gamma=0.0, size_average=True, tn=None):
    """Focal loss. preds_nchw: [B, C, H, W] float; target_nhw: [B, H, W] int."""
    B, C, H, W = preds_nchw.shape
    HW = H * W
    N = B * HW

    preds3d = preds_nchw.reshape(B, C, HW)          # free reshape (native layout)
    target3d = target_nhw.reshape(B, 1, HW)         # native (possibly narrow) dtype, no upcast

    tn_eff = _pick_tn(C, HW, preds3d.dtype.itemsize, tn)
    nj = pl.cdiv(HW, tn_eff)
    # Split spatial tiles over an outer parallel axis when it divides evenly
    # (gives v7x's two TensorCores parallel extent even when B is small).
    n_outer = 2 if (nj >= 2 and nj % 2 == 0) else 1
    n_inner = nj // n_outer
    needs_mask = (HW % tn_eff) != 0

    kernel = functools.partial(
        _focal_loss_kernel, gamma=float(gamma), hw=HW, tn=tn_eff,
        n_inner=n_inner, nj=nj, needs_mask=needs_mask)

    # Explicit VMEM budget: double-buffered preds + targets + accumulator + slack.
    preds_tile_b = C * tn_eff * preds3d.dtype.itemsize
    tgt_tile_b = tn_eff * target3d.dtype.itemsize
    need = 2 * preds_tile_b + 2 * tgt_tile_b + 4 * tn_eff + (2 << 20)
    vmem_limit = int(min(48 << 20, max(32 << 20, need)))
    # TODO(synk): for very large C (tens of thousands) even tn=128 exceeds this
    # budget; class-axis tiling with an online logsumexp would be needed there.

    partials = pl.pallas_call(
        kernel,
        out_shape=jax.ShapeDtypeStruct((B, n_outer, 1, 1), jnp.float32),
        grid_spec=pltpu.PrefetchScalarGridSpec(
            num_scalar_prefetch=0,
            grid=(B, n_outer, n_inner),
            in_specs=[
                pl.BlockSpec((1, C, tn_eff), lambda b, o, j: (b, 0, o * n_inner + j)),
                pl.BlockSpec((1, 1, tn_eff), lambda b, o, j: (b, 0, o * n_inner + j)),
            ],
            out_specs=pl.BlockSpec((1, 1, 1, 1), lambda b, o, j: (b, o, 0, 0)),
            scratch_shapes=[pltpu.VMEM((1, tn_eff), jnp.float32)],
        ),
        compiler_params=pltpu.CompilerParams(
            dimension_semantics=("parallel", "parallel", "arbitrary"),
            vmem_limit_bytes=vmem_limit),
    )(preds3d, target3d)

    total = jnp.sum(partials)
    if size_average:
        return total / jnp.float32(N)
    return total


def focal_loss_ref(preds_nchw, target_nhw, *, gamma=0.0, size_average=True):
    """Pure-JAX reference mirroring the PyTorch forward."""
    B, C, H, W = preds_nchw.shape
    N = B * H * W
    preds2d = jnp.transpose(preds_nchw.reshape(B, C, H * W), (0, 2, 1)).reshape(N, C)
    tgt = target_nhw.reshape(N).astype(jnp.int32)
    logp = jax.nn.log_softmax(preds2d.astype(jnp.float32), axis=-1)
    logpt = jnp.take_along_axis(logp, tgt[:, None], axis=1)[:, 0]
    pt = jnp.exp(logpt)
    loss = -((1.0 - pt) ** gamma) * logpt
    return jnp.mean(loss) if size_average else jnp.sum(loss)


# TODO(synk): ignore_label filtering (dynamic row selection) and the C==1
# sigmoid branch are not implemented; defaults (ignore_label=None, C>1) are
# reproduced exactly.  (The alpha weighting in the original module is commented
# out in its forward, so it has no effect on the reference semantics.)

if __name__ == "__main__":
    key = jax.random.PRNGKey(0)
    kp, kt, kp2, kt2 = jax.random.split(key, 4)

    # Case 1: module-typical small shapes (single spatial tile, mean reduction).
    B, C, H, W = 2, 4, 16, 16
    preds = jax.random.normal(kp, (B, C, H, W), dtype=jnp.float32)
    target = jax.random.randint(kt, (B, H, W), 0, C, dtype=jnp.int32)
    out = jax.block_until_ready(focal_loss(preds, target, gamma=2.0, size_average=True))
    ref = focal_loss_ref(preds, target, gamma=2.0, size_average=True)
    assert jnp.allclose(out, ref, rtol=1e-4, atol=1e-5), (out, ref)

    # Case 2: exercises multi-tile pipeline, outer spatial split and ragged-edge mask
    # (HW=400, tn=128 -> 4 tiles = 2 outer x 2 inner, last tile ragged), sum reduction.
    B2, C2, H2, W2 = 1, 5, 20, 20
    preds2 = jax.random.normal(kp2, (B2, C2, H2, W2), dtype=jnp.float32)
    target2 = jax.random.randint(kt2, (B2, H2, W2), 0, C2, dtype=jnp.int32)
    out2 = jax.block_until_ready(
        focal_loss(preds2, target2, gamma=2.0, size_average=False, tn=128))
    ref2 = focal_loss_ref(preds2, target2, gamma=2.0, size_average=False)
    assert jnp.allclose(out2, ref2, rtol=1e-4, atol=1e-4), (out2, ref2)

    print("KERNEL_OK")
</pallas_src>

<mosaic_0001>
module attributes {stable_mosaic.version = 11 : i64} {
  func.func @_focal_loss_kernel(%arg0: i32, %arg1: i32, %arg2: i32, %arg3: memref<1x4x256xf32, #tpu.memory_space<vmem>>, %arg4: memref<1x1x256xi32, #tpu.memory_space<vmem>>, %arg5: memref<1x1x1x1xf32, #tpu.memory_space<vmem>>, %arg6: memref<1x256xf32, #tpu.memory_space<vmem>>) attributes {dimension_semantics = [#tpu.dimension_semantics<parallel>, #tpu.dimension_semantics<parallel>, #tpu.dimension_semantics<arbitrary>], iteration_bounds = array<i64: 2, 1, 1>, scalar_prefetch = 0 : i64, scratch_operands = 1 : i64, tpu.core_type = #tpu.core_type<tc>, window_params = [{transform_indices = @transform_0, window_bounds = array<i64: 1, 4, 256>}, {transform_indices = @transform_1, window_bounds = array<i64: 1, 1, 256>}, {transform_indices = @transform_2, window_bounds = array<i64: 1, 1, 1, 1>}]} {
    %c0_i32 = arith.constant 0 : i32
    %0 = arith.cmpi eq, %arg2, %c0_i32 : i32
    %1 = arith.extui %0 : i1 to i32
    %c0_i32_0 = arith.constant 0 : i32
    %2 = arith.cmpi ne, %1, %c0_i32_0 : i32
    scf.if %2 {
      %cst_17 = arith.constant 0.000000e+00 : f32
      %38 = vector.broadcast %cst_17 : f32 to vector<1x256xf32>
      %c0_18 = arith.constant 0 : index
      %c0_19 = arith.constant 0 : index
      %39 = vector.load %arg6[%c0_18, %c0_19] : memref<1x256xf32, #tpu.memory_space<vmem>>, vector<1x256xf32>
      tpu.vector_store %arg6[%c0_18, %c0_19], %38 {strides = array<i32>} : memref<1x256xf32, #tpu.memory_space<vmem>>, vector<1x256xf32>,
    } else {
    }
    %c0 = arith.constant 0 : index
    %c0_1 = arith.constant 0 : index
    %c0_2 = arith.constant 0 : index
    %3 = vector.load %arg3[%c0, %c0_1, %c0_2] : memref<1x4x256xf32, #tpu.memory_space<vmem>>, vector<1x4x256xf32>
    %4 = vector.shape_cast %3 : vector<1x4x256xf32> to vector<4x256xf32>
    %c0_3 = arith.constant 0 : index
    %c0_4 = arith.constant 0 : index
    %c0_5 = arith.constant 0 : index
    %5 = vector.load %arg4[%c0_3, %c0_4, %c0_5] : memref<1x1x256xi32, #tpu.memory_space<vmem>>, vector<1x1x256xi32>
    %6 = vector.shape_cast %5 : vector<1x1x256xi32> to vector<1x256xi32>
    %cst = arith.constant dense<0xFF800000> : vector<256xf32>
    %7 = vector.multi_reduction <maximumf>, %4, %cst [0] : vector<4x256xf32> to vector<256xf32>
    %8 = vector.shape_cast %7 : vector<256xf32> to vector<1x256xf32>
    %9 = vector.broadcast %8 : vector<1x256xf32> to vector<4x256xf32>
    %10 = arith.subf %4, %9 : vector<4x256xf32>
    %11 = math.exp %10 : vector<4x256xf32>
    %cst_6 = arith.constant dense<0.000000e+00> : vector<256xf32>
    %12 = vector.multi_reduction <add>, %11, %cst_6 [0] : vector<4x256xf32> to vector<256xf32>
    %13 = vector.shape_cast %12 : vector<256xf32> to vector<1x256xf32>
    %14 = math.log %13 : vector<1x256xf32>
    %15 = arith.addf %8, %14 : vector<1x256xf32>
    %16 = tpu.iota {dimensions = array<i32: 0>} : vector<4x1xi32>
    %17 = vector.broadcast %16 : vector<4x1xi32> to vector<4x256xi32>
    %18 = vector.broadcast %6 : vector<1x256xi32> to vector<4x256xi32>
    %19 = arith.cmpi eq, %17, %18 : vector<4x256xi32>
    %cst_7 = arith.constant 0.000000e+00 : f32
    %20 = vector.broadcast %cst_7 : f32 to vector<4x256xf32>
    %21 = arith.select %19, %4, %20 : vector<4x256xi1>, vector<4x256xf32>
    %cst_8 = arith.constant dense<0.000000e+00> : vector<256xf32>
    %22 = vector.multi_reduction <add>, %21, %cst_8 [0] : vector<4x256xf32> to vector<256xf32>
    %23 = vector.shape_cast %22 : vector<256xf32> to vector<1x256xf32>
    %24 = arith.subf %23, %15 : vector<1x256xf32>
    %25 = math.exp %24 : vector<1x256xf32>
    %cst_9 = arith.constant 1.000000e+00 : f32
    %26 = vector.broadcast %cst_9 : f32 to vector<1x256xf32>
    %27 = arith.subf %26, %25 : vector<1x256xf32>
    %28 = arith.mulf %27, %27 : vector<1x256xf32>
    %cst_10 = arith.constant 0.000000e+00 : f32
    %29 = vector.broadcast %cst_10 : f32 to vector<1x256xf32>
    %30 = arith.subf %29, %28 : vector<1x256xf32>
    %31 = arith.mulf %30, %24 : vector<1x256xf32>
    %c0_11 = arith.constant 0 : index
    %c0_12 = arith.constant 0 : index
    %32 = vector.load %arg6[%c0_11, %c0_12] : memref<1x256xf32, #tpu.memory_space<vmem>>, vector<1x256xf32>
    %33 = arith.addf %32, %31 : vector<1x256xf32>
    %c0_13 = arith.constant 0 : index
    %c0_14 = arith.constant 0 : index
    %34 = vector.load %arg6[%c0_13, %c0_14] : memref<1x256xf32, #tpu.memory_space<vmem>>, vector<1x256xf32>
    tpu.vector_store %arg6[%c0_13, %c0_14], %33 {strides = array<i32>} : memref<1x256xf32, #tpu.memory_space<vmem>>, vector<1x256xf32>,
    %c0_i32_15 = arith.constant 0 : i32
    %35 = arith.cmpi eq, %arg2, %c0_i32_15 : i32
    %36 = arith.extui %35 : i1 to i32
    %c0_i32_16 = arith.constant 0 : i32
    %37 = arith.cmpi ne, %36, %c0_i32_16 : i32
    scf.if %37 {
      %c0_17 = arith.constant 0 : index
      %c0_18 = arith.constant 0 : index
      %38 = vector.load %arg6[%c0_17, %c0_18] : memref<1x256xf32, #tpu.memory_space<vmem>>, vector<1x256xf32>
      %39 = vector.shape_cast %38 : vector<1x256xf32> to vector<1x1x256xf32>
      %cst_19 = arith.constant dense<0.000000e+00> : vector<1xf32>
      %40 = vector.multi_reduction <add>, %39, %cst_19 [1, 2] : vector<1x1x256xf32> to vector<1xf32>
      %41 = vector.shape_cast %40 : vector<1xf32> to vector<1x1x1xf32>
      %42 = vector.extract %41[0, 0, 0] : f32 from vector<1x1x1xf32>
      %43 = vector.broadcast %42 : f32 to vector<1x1x1x1xf32>
      %c0_20 = arith.constant 0 : index
      %c0_21 = arith.constant 0 : index
      %c0_22 = arith.constant 0 : index
      %c0_23 = arith.constant 0 : index
      %44 = vector.load %arg5[%c0_20, %c0_21, %c0_22, %c0_23] : memref<1x1x1x1xf32, #tpu.memory_space<vmem>>, vector<1x1x1x1xf32>
      tpu.vector_store %arg5[%c0_20, %c0_21, %c0_22, %c0_23], %43 {strides = array<i32>} : memref<1x1x1x1xf32, #tpu.memory_space<vmem>>, vector<1x1x1x1xf32>,
    } else {
    }
    return
  }
  func.func @transform_0(%arg0: i32, %arg1: i32, %arg2: i32) -> (i32, i32, i32) {
    %c1_i32 = arith.constant 1 : i32
    %0 = arith.muli %arg1, %c1_i32 : i32
    %1 = arith.addi %0, %arg2 : i32
    %c0_i32 = arith.constant 0 : i32
    %c0_i32_0 = arith.constant 0 : i32
    return %arg0, %c0_i32, %1 : i32, i32, i32
  }
  func.func @transform_1(%arg0: i32, %arg1: i32, %arg2: i32) -> (i32, i32, i32) {
    %c1_i32 = arith.constant 1 : i32
    %0 = arith.muli %arg1, %c1_i32 : i32
    %1 = arith.addi %0, %arg2 : i32
    %c0_i32 = arith.constant 0 : i32
    %c0_i32_0 = arith.constant 0 : i32
    return %arg0, %c0_i32, %1 : i32, i32, i32
  }
  func.func @transform_2(%arg0: i32, %arg1: i32, %arg2: i32) -> (i32, i32, i32, i32) {
    %c0_i32 = arith.constant 0 : i32
    %c0_i32_0 = arith.constant 0 : i32
    %c0_i32_1 = arith.constant 0 : i32
    return %arg0, %arg1, %c0_i32, %c0_i32_0 : i32, i32, i32, i32
  }
}

</mosaic_0001>

<bundles_post_ra>
// kernel: tpu_custom_call.1
= control target key start
LH: loop header
LB: loop body
LE: loop exit
PB: predicated region body
PF: predicated region fallthrough
CT: control target
= control target key end

     0   :  { %7 = vsyncpa [#allocation4], 0  ;;  %s931_s0 = inlined_call_operand.hbm [shape: f32[2,4,256], index: 0, kind: input, shape index: {}]   ;;  %s932_s1 = inlined_call_operand.hbm [shape: s32[2,1,256], index: 1, kind: input, shape index: {}]   ;;  %s933_s2 = inlined_call_operand.vmem [shape: f32[2,1,1,1], index: 2, kind: output, shape index: {}]  }
   0x1   :  { %9 = vsyncpa [#allocation4 + $0x1], 0 }
   0x2   :  { %10 = vsyncpa [#allocation6], 0 }
   0x3   :  { %12 = vsyncpa [#allocation6 + $0x1], 0  ;;  %s736_s9 = smov 0   ;;  %s738_s10 = smov 0  }
   0x4   :  { %s740_s11 = smov 0   ;;  %s742_s12 = smov 0  }
   0x5   :  { %s744_s13 = smov 0   ;;  %s746_s14 = smov 0  }
   0x6 LB: > { %s509_s15 = sadd.s32 4294967295, %s715_s14   ;;  %s37_s16 = sadd.s32 1, %s711_s13  ;;  %s715_s14 = sphi %s746_s14, %s18_s14   ;;  %s711_s13 = sphi %s744_s13, %s949_s13   ;;  %s707_s12 = sphi %s742_s12, %s948_s12   ;;  %s703_s11 = sphi %s740_s11, %s947_s11   ;;  %s699_s10 = sphi %s738_s10, %s946_s10   ;;  %s695_s9 = sphi %s736_s9, %s945_s9  }
   0x7   : > { %p39_p0 = scmp.ge.s32.totalorder %s37_s16, 2  ;;  %s48_s17 = sadd.s32 1, %s703_s11 }
   0x8   : > { %p55_p1 = scmp.ne.s32.totalorder %s703_s11, %s699_s10  ;;  %p56_p2 = scmp.eq.s32.totalorder %s715_s14, 0 }
   0x9   : > { %s951_s16 = smov (%p39_p0, %s37_s16), 0  ;;  %p61_p4 = scmp.ne.s32.totalorder %s699_s10, %s695_s9 }
   0xa   : > { %p772_p3 = por %p56_p2, %p55_p1  ;;  %s43_s19 = ssub.s32 %s711_s13, %s951_s16 }
   0xb   : > { %p62_p5 = scmp.eq.s32.totalorder %s509_s15, 0  ;;  %p46_p6 = scmp.eq.s32.totalorder %s43_s19, 0 }
   0xc   : > { %p539_p8 = scmp.lt.s32.totalorder %s715_s14, 2  ;;  %s788_s22 = sand.u32 1, %s703_s11  }
   0xd   : > { %p779_p7 = por %p62_p5, %p61_p4  ;;  %s524_s23 = sshll.u32 %s711_s13, 7 }
   0xe   : > { %s785_s21 = scalar_select %p46_p6, %s703_s11, %s48_s17  }
   0xf   : > { %s936_s20 = scalar_select %p779_p7, 1, 0 }
  0x10   : > { %s513_s24 = sshll.u32 %s788_s22, 3  ;;  %s795_s27 = scalar_lea.hbm %s931_s0, %s524_s23 }
  0x11   : > { %s147_s28 = scalar_lea.vmem [#allocation3], %s513_s24  ;;  %p799_p9 = pnand %p539_p8, %p772_p3 }
  0x12   : > { %s158_s29 = sshll.u32 %s147_s28, 4  ;;  %s144_s3 = scalar_lea.sflag [#allocation4], %s788_s22  ;;  %s803_s29 = int_to_ptr.vmem [resolvable:$true] %s158_s29 }
  0x13   : > { %s601_s4 = scalar_lea.hbm %s795_s27, 128  ;;  %p603_p13 = pneg %p799_p9 }
  0x14   : > { %p602_p12 = scmp.ne.s32.totalorder %s795_s27, %s601_s4  ;;  %s606_s7 = scalar_lea.hbm %s931_s0, 256 }
  0x15   : > { %p607_p2 = scmp.lt.u32.totalorder %s795_s27, %s931_s0  ;;  %p608_p3 = scmp.lt.u32.totalorder %s606_s7, %s601_s4 }
  0x16   : > { %p604_p0 = pnand %p603_p13, %p602_p12  ;;  %p610_p5 = scmp.lt.u32.totalorder %s601_s4, %s795_s27 }
  0x17   : > { %p609_p4 = por %p608_p3, %p607_p2 }
  0x18   : > { %p605_p1 = pneg %p604_p0 }
  0x19   : > { %p611_p6 = por %p610_p5, %p609_p4 }
  0x1b   : > { %p612_p8 = pnand %p611_p6, %p605_p1 }
  0x1d   : > { %615 = shalt.err (!%p612_p8)
}
  0x1e   : > { %s616_s15 = scalar_lea.vmem %s803_s29, 128  ;;  %s717_s17 = smov [#allocation3]  }
  0x1f   : > { %p617_p12 = scmp.ne.s32.totalorder %s803_s29, %s616_s15  ;;  %s621_s18 = sshll.u32 %s717_s17, 4  ;;  %s622_s18 = int_to_ptr.vmem [resolvable:$false] %s621_s18 }
  0x20   : > { %s623_s19 = scalar_lea.vmem %s622_s18, 256  ;;  %p624_p11 = scmp.lt.s32.totalorder %s803_s29, %s622_s18 }
  0x21   : > { %p619_p0 = pnand %p617_p12, %p603_p13  ;;  %p625_p2 = scmp.lt.s32.totalorder %s623_s19, %s616_s15 }
  0x23   : > { %p620_p10 = pneg %p619_p0  ;;  %p626_p3 = por %p625_p2, %p624_p11 }
  0x25   : > { %p627_p4 = pnand %p626_p3, %p620_p10 }
  0x27   : > { %630 = shalt.err (!%p627_p4)
}
  0x28   : > { %535 = dma.hbm_to_vmem [thread:$0]  (!%p799_p9), %s795_s27, 128, %s803_s29, %s144_s3  }
  0x29   : > { %p938_p1 = scmp.lt.s32.totalorder %s715_s14, 3  ;;  %p939_p5 = scmp.ge.s32.totalorder %s715_s14, 1 }
  0x2a   : > { %s516_s24 = sshll.u32 %s788_s22, 1  ;;  %s525_s25 = sshll.u32 %s711_s13, 5 }
  0x2b   : > { %p837_p6 = pnand %p939_p5, %p938_p1  ;;  %s846_s4 = scalar_lea.hbm %s932_s1, %s525_s25 }
  0x2c   : > { %s169_s5 = scalar_lea.vmem [#allocation5], %s516_s24  ;;  %s166_s27 = scalar_lea.sflag [#allocation6], %s788_s22 }
  0x2d   : > { %s940_s23 = scalar_select %p837_p6, 1, 0 }
  0x2e   : > { %s180_s6 = sshll.u32 %s169_s5, 4  ;;  %s631_s29 = scalar_lea.hbm %s846_s4, 32  ;;  %s181_s6 = int_to_ptr.vmem [resolvable:$true] %s180_s6 }
  0x2f   : > { %p632_p10 = scmp.ne.s32.totalorder %s846_s4, %s631_s29  ;;  %s636_s8 = scalar_lea.hbm %s932_s1, 64 }
  0x30   : > { %p637_p12 = scmp.lt.u32.totalorder %s846_s4, %s932_s1  ;;  %p638_p0 = scmp.lt.u32.totalorder %s636_s8, %s631_s29 }
  0x31   : > { %p634_p11 = pnand %p632_p10, %p603_p13  ;;  %p640_p3 = scmp.lt.u32.totalorder %s631_s29, %s846_s4 }
  0x32   : > { %p639_p2 = por %p638_p0, %p637_p12 }
  0x33   : > { %p635_p8 = pneg %p634_p11 }
  0x34   : > { %p641_p4 = por %p640_p3, %p639_p2 }
  0x36   : > { %p642_p1 = pnand %p641_p4, %p635_p8 }
  0x38   : > { %645 = shalt.err (!%p642_p1)
}
  0x39   : > { %s646_s22 = scalar_lea.vmem %s181_s6, 32  ;;  %s718_s17 = smov [#allocation5]  }
  0x3a   : > { %p647_p5 = scmp.ne.s32.totalorder %s181_s6, %s646_s22  ;;  %s651_s18 = sshll.u32 %s718_s17, 4  ;;  %s652_s18 = int_to_ptr.vmem [resolvable:$false] %s651_s18 }
  0x3b   : > { %s653_s19 = scalar_lea.vmem %s652_s18, 64  ;;  %p654_p7 = scmp.lt.s32.totalorder %s181_s6, %s652_s18 }
  0x3c   : > { %p649_p10 = pnand %p647_p5, %p603_p13  ;;  %p655_p6 = scmp.lt.s32.totalorder %s653_s19, %s646_s22 }
  0x3e   : > { %p650_p11 = pneg %p649_p10  ;;  %p656_p0 = por %p655_p6, %p654_p7 }
  0x40   : > { %p657_p12 = pnand %p656_p0, %p650_p11 }
  0x42   : > { %660 = shalt.err (!%p657_p12)
}
  0x43   : > { %538 = dma.hbm_to_vmem [thread:$0]  (!%p799_p9), %s846_s4, 32, %s181_s6, %s166_s27  }
  0x44   : > { %p941_p8 = scmp.ne.s32.totalorder %s940_s23, 0 }
  0x45   : > { %s191_s24 = sand.u32 (!%p941_p8), 1, %s699_s10   ;;  %p942_p13 = scmp.ne.s32.totalorder (!%p941_p8), %s936_s20, 0 }
  0x46   : > { %189 = sbr.rel (%p941_p8) target bundleno = 394 (0x18a), region = 28  ;;  %s520_s25 = sshll.u32 (!%p941_p8), %s191_s24, 3 }
  0x47   : > { %s192_s26 = scalar_lea.sflag (!%p941_p8), [#allocation4], %s191_s24  ;;  %s195_s28 = scalar_lea.vmem (!%p941_p8), [#allocation3], %s520_s25 }
  0x4d   : > { %686 = dma.done.wait (%p942_p13), %s192_s26, 128  }
  0x4e   : > { %688 = vsyncadd (%p942_p13), %s192_s26, 4294967168  ;;  %s521_s5 = sshll.u32 %s191_s24, 1  ;;  %s201_s29 = scalar_lea.sflag [#allocation6], %s191_s24 }
  0x4f   : > { %s204_s30 = scalar_lea.vmem [#allocation5], %s521_s5 }
  0x50   : > { %690 = dma.done.wait (%p942_p13), %s201_s29, 32  }
  0x51   : > { %692 = vsyncadd (%p942_p13), %s201_s29, 4294967264  ;;  %v245_v0 = vlaneseq  ;;  %v719_v2 = vmov 0.0   ;;  %vm255_vm1 = vcmask 1043456   ;;  %v250_v3 = vld [vmem:[%s195_s28] sm:$0xff]  ;;  %v251_v24 = vld [vmem:[%s204_s30] sm:$0x3] }
  0x52   : > { %v253_v4 = vcombine.high %v250_v3, %v250_v3  ;;  %v256_v5 = vsel %vm255_vm1, %v250_v3, -inf  ;;  %vm382_vm4 = vcmask 1040384   ;;  %p235_p7 = scmp.lt.s32.totalorder %s707_s12, 1  ;;  %vm396_vm5 = vcmask 0  }
  0x53   : > { %vm879_vm0 = vcmp.lt.s32.totalorder %v245_v0, 256  ;;  %v257_v6 = vrot.slane %v256_v5, 4  ;;  %v887_v20 = vshrl.u32 %v245_v0, 7 }
  0x54   : > { %249 = vst.msk [vmem:[#allocation2] sm:$0x3] %vm879_vm0, %v719_v2  ;;  %v263_v7 = vsel %vm255_vm1, %v253_v4, -inf  ;;  %s953_s12 = smov (!%p235_p7, %s707_s12), 1 }
  0x55   : > { %v258_v8 = vmax.f32 %v256_v5, %v257_v6  ;;  %v264_v9 = vrot.slane %v263_v7, 4  ;;  %v304_v23 = vsub.s32 0, %v887_v20  ;;  %v308_v25 = vsub.s32 1, %v887_v20  ;;  %s240_s4 = scalar_lea.vmem %s933_s2, %s953_s12 }
  0x57   : > { %v259_v10 = vrot.slane %v258_v8, 2  ;;  %v265_v11 = vmax.f32 %v263_v7, %v264_v9  ;;  %v305_v26 = vrot.slane %v251_v24, %v304_v23  ;;  %v309_v27 = vrot.slane %v251_v24, %v308_v25 }
  0x58   : > { %v720_v9 = vmov 1966171168  }
  0x59   : > { %v260_v12 = vmax.f32 %v258_v8, %v259_v10  ;;  %v266_v13 = vrot.slane %v265_v11, 2  ;;  %vm310_vm2 = vcmp.eq.s32.totalorder %v887_v20, %v305_v26  ;;  %vm311_vm3 = vcmp.eq.s32.totalorder %v887_v20, %v309_v27 }
  0x5a   : > { %v312_v28 = vsel %vm310_vm2, %v250_v3, 0.0  ;;  %v313_v32 = vsel %vm311_vm3, %v253_v4, 0.0  ;;  %v347_v10 = vunpack.c.l.s4 %v720_v9 }
  0x5b   : > { %v261_v14 = vrot.slane %v260_v12, 1  ;;  %v267_v15 = vmax.f32 %v265_v11, %v266_v13  ;;  %v314_v34 = vsel %vm255_vm1, %v312_v28, 0.0  ;;  %v321_v38 = vsel %vm255_vm1, %v313_v32, 0.0  ;;  %v342_v26 = vld [vmem:[#allocation2] sm:$0x3] }
  0x5c   : > { %v315_v39 = vrot.slane %v314_v34, 4  ;;  %v322_v42 = vrot.slane %v321_v38, 4 }
  0x5d   : > { %v262_v16 = vmax.f32 %v260_v12, %v261_v14  ;;  %v268_v17 = vrot.slane %v267_v15, 1 }
  0x5e   : > { %v316_v45 = vadd.f32 %v315_v39, %v314_v34  ;;  %v323_v48 = vadd.f32 %v322_v42, %v321_v38 }
  0x5f   : > { %v269_v18 = vmax.f32 %v267_v15, %v268_v17  ;;  %v348_v17 = vunpack.c.0.s8 %v347_v10 }
  0x60   : > { %v317_v51 = vrot.slane %v316_v45, 2  ;;  %v324_v53 = vrot.slane %v323_v48, 2 }
  0x61   : > { %v272_v19 = vcombine.low %v262_v16, %v269_v18 }
  0x62   : > { %v318_v54 = vadd.f32 %v317_v51, %v316_v45  ;;  %v325_v55 = vadd.f32 %v324_v53, %v323_v48 }
  0x63   : > { %v274_v21 = vsub.f32 %v250_v3, %v272_v19 }
  0x64   : > { %v319_v56 = vrot.slane %v318_v54, 1  ;;  %v326_v57 = vrot.slane %v325_v55, 1 }
  0x65   : > { %v275_v22 = vmul.f32 1.442695, %v274_v21 }
  0x66   : > { %v320_v60 = vadd.f32 %v319_v56, %v318_v54  ;;  %v327_v0 = vadd.f32 %v326_v57, %v325_v55 }
  0x67   : > { %591 = vpow2.f32 %v275_v22 }
  0x71   : > { %v592_v29 = vpop.eup %591 }
  0x72   : > { %v278_v30 = vcombine.high %v592_v29, %v592_v29  ;;  %v280_v31 = vsel %vm255_vm1, %v592_v29, 0.0 }
  0x73   : > { %v281_v33 = vrot.slane %v280_v31, 4 }
  0x74   : > { %v287_v35 = vsel %vm255_vm1, %v278_v30, 0.0 }
  0x75   : > { %v282_v36 = vadd.f32 %v281_v33, %v280_v31  ;;  %v288_v37 = vrot.slane %v287_v35, 4 }
  0x77   : > { %v283_v40 = vrot.slane %v282_v36, 2  ;;  %v289_v41 = vadd.f32 %v288_v37, %v287_v35 }
  0x79   : > { %v284_v43 = vadd.f32 %v283_v40, %v282_v36  ;;  %v290_v44 = vrot.slane %v289_v41, 2 }
  0x7b   : > { %v285_v46 = vrot.slane %v284_v43, 1  ;;  %v291_v47 = vadd.f32 %v290_v44, %v289_v41 }
  0x7d   : > { %v286_v49 = vadd.f32 %v285_v46, %v284_v43  ;;  %v292_v50 = vrot.slane %v291_v47, 1 }
  0x7f   : > { %v293_v52 = vadd.f32 %v292_v50, %v291_v47  ;;  %593 = vlog2.f32 %v286_v49 }
  0x81   : > { %595 = vlog2.f32 %v293_v52 }
  0x89   : > { %v594_v58 = vpop.eup %593 }
  0x8a   : > { %v295_v59 = vmul.f32 0.6931472, %v594_v58 }
  0x8b   : > { %v596_v61 = vpop.eup %595 }
  0x8c   : > { %v297_v62 = vmul.f32 0.6931472, %v596_v61  ;;  %v298_v63 = vadd.f32 %v295_v59, %v262_v16 }
  0x8e   : > { %v299_v2 = vadd.f32 %v297_v62, %v269_v18  ;;  %v328_v3 = vsub.f32 %v320_v60, %v298_v63  ;;  %v351_v18 = vsub.s32 %v348_v17, %v887_v20 }
  0x90   : > { %v329_v4 = vsub.f32 %v327_v0, %v299_v2  ;;  %v330_v5 = vmul.f32 1.442695, %v328_v3 }
  0x92   : > { %597 = vpow2.f32 %v330_v5  ;;  %v332_v6 = vmul.f32 1.442695, %v329_v4 }
  0x94   : > { %599 = vpow2.f32 %v332_v6 }
  0x9c   : > { %v598_v7 = vpop.eup %597 }
  0x9d   : > { %v334_v8 = vsub.f32 1.0, %v598_v7 }
  0x9e   : > { %v600_v11 = vpop.eup %599 }
  0x9f   : > { %v335_v12 = vsub.f32 1.0, %v600_v11  ;;  %v336_v13 = vmul.f32 %v334_v8, %v334_v8 }
  0xa1   : > { %v337_v14 = vmul.f32 %v335_v12, %v335_v12  ;;  %v338_v15 = vsub.f32 0.0, %v336_v13 }
  0xa3   : > { %v339_v19 = vsub.f32 0.0, %v337_v14  ;;  %v340_v16 = vmul.f32 %v338_v15, %v328_v3 }
  0xa5   : > { %v341_v21 = vmul.f32 %v339_v19, %v329_v4 }
  0xa7   : > { %v345_v22 = vcombine.low %v340_v16, %v341_v21 }
  0xa9   : > { %v352_v24 = vrot.slane %v345_v22, %v351_v18 }
  0xab   : > { %v359_v27 = vrot.slane %v352_v24, %v351_v18 }
  0xad   : > { %v361_v28 = vadd.f32 %v359_v27, %v342_v26 }
  0xaf   : > { %366 = vst.msk [vmem:[#allocation2] sm:$0x3] %vm879_vm0, %v361_v28 }
  0xb6   : > { %v370_v29 = vld [vmem:[#allocation2] sm:$0x3] }
  0xb7   : > { %v375_v30 = vrot.slane %v370_v29, %v304_v23  ;;  %v379_v31 = vrot.slane %v370_v29, %v308_v25 }
  0xb9   : > { %v383_v32 = vsel %vm382_vm4, %v375_v30, 0.0  ;;  %v384_v33 = vsel %vm382_vm4, %v379_v31, 0.0 }
  0xba   : > { %v385_v34 = vadd.f32 %v384_v33, %v383_v32 }
  0xbc   : > { %386 = vadd.xlane.f32.xlu0 %v385_v34 }
 0x149   : > { %v387_v35 = vpop.xlane.xlu0 %386 }
 0x14a   : > { %v388_v36 = vrot.slane %v387_v35, 4 }
 0x14c   : > { %v389_v37 = vadd.f32 %v388_v36, %v387_v35 }
 0x14e   : > { %v390_v38 = vrot.slane %v389_v37, 2 }
 0x150   : > { %v391_v1 = vadd.f32 %v390_v38, %v389_v37 }
 0x152   : > { %v392_v39 = vrot.slane %v391_v1, 1 }
 0x154   : > { %v393_v40 = vadd.f32 %v392_v39, %v391_v1 }
 0x156   : > { %526 = vpush %v393_v40 }
 0x187   : > { %s527_s6 = spop %526 }
 0x188   : > { %v395_v20 = vstv %s527_s6 }
 0x189   : > { %397 = vst.msk [vmem:[%s240_s4] sm:$0x1] %vm396_vm5, %v395_v20 }
 0x18a PF: > { %s18_s14 = sadd.s32 1, %s715_s14   ;;  %s945_s9 = smov %s699_s10 }
 0x18b   : > { %p15_p9 = scmp.ge.s32.totalorder %s18_s14, 4   ;;  %s946_s10 = smov %s703_s11 }
 0x18c   : > { %s947_s11 = smov %s785_s21  ;;  %s948_s12 = smov %s711_s13 }
 0x18d   : > { %s949_s13 = smov %s951_s16  ;;  %17 = sbr.rel (!%p15_p9) target bundleno = 6 (0x6), region = 89 }
 0x194   :  { %421 = vsyncpa [#allocation4], 1 }
 0x195   :  { %423 = vsyncpa [#allocation4 + $0x1], 1 }
 0x196   :  { %424 = vsyncpa [#allocation6], 1 }
 0x197   :  { %426 = vsyncpa [#allocation6 + $0x1], 1 }

</bundles_post_ra>
